<compile_context>
chip_gen: v7x
topology: tpu7x:2x2x1
jax: 0.10.0
libtpu: 0.0.40
codegen_flags: <defaults>
</compile_context>

<pallas_src>
import jax
import jax.numpy as jnp
from jax.experimental import pallas as pl
from jax.experimental.pallas import tpu as pltpu


_LANE = 128


def _round_up(x, m):
    return (x + m - 1) // m * m


def _vmem_budgets():
    """Returns (per-block tile budget bytes, explicit vmem limit bytes)."""
    try:
        vmem_cap = pltpu.get_tpu_info().vmem_capacity_bytes
    except Exception:
        vmem_cap = 64 << 20                   # conservative (v7x-sized) fallback
    if vmem_cap >= (128 << 20):               # v5e / v6e: 128 MiB physical VMEM
        return 8 << 20, 64 << 20
    return 4 << 20, 32 << 20                  # v7x: 64 MiB physical VMEM per TC


def _pick_tile_hw(hw_pad, per_lane_bytes, budget_bytes):
    """Largest multiple of 128 dividing hw_pad whose block fits the budget."""
    best = _LANE
    t = _LANE
    while t <= hw_pad:
        if hw_pad % t == 0 and t * per_lane_bytes <= budget_bytes:
            best = t
        t += _LANE
    return best


def _make_channel_attention_kernel(C, num_chunks, chunk_w, tile_hw,
                                   hw_valid, inv_hw, has_pad):
    """Kernel for a fixed (num_chunks, chunk_w) tiling. Grid = (B, num_steps)."""
    unroll = num_chunks <= 8  # short fixed trip counts: give LLO full visibility

    def kernel(x_ref, w1_ref, w2_ref, o_ref, sum_acc, max_acc):
        k = pl.program_id(1)

        @pl.when(k == 0)
        def _init():
            sum_acc[...] = jnp.zeros_like(sum_acc)
            max_acc[...] = jnp.full_like(max_acc, -jnp.inf)

        # Stream the block 128 lanes at a time: slice the ref (no full-block
        # f32 copy), cast the chunk, accumulate into the f32 VMEM accumulators.
        def chunk_body(j, carry):
            start = pl.multiple_of(j * chunk_w, chunk_w)
            c = x_ref[:, :, pl.ds(start, chunk_w)].astype(jnp.float32)  # (1,C,cw)
            sum_acc[...] = sum_acc[...] + c
            if has_pad:
                # Mask the zero-padded tail lanes to -inf for the max path.
                pos = (k * tile_hw + j * chunk_w
                       + jax.lax.broadcasted_iota(jnp.int32, (1, 1, chunk_w), 2))
                c = jnp.where(pos < hw_valid, c, -jnp.inf)
            max_acc[...] = jnp.maximum(max_acc[...], c)
            return carry

        jax.lax.fori_loop(0, num_chunks, chunk_body, 0, unroll=unroll)

        @pl.when(k == pl.num_programs(1) - 1)
        def _finalize():
            # Single cross-lane (XLU) reduce per output.
            avg = jnp.sum(sum_acc[...], axis=-1) * inv_hw          # (1, C)
            mx = jnp.max(max_acc[...], axis=-1)                    # (1, C)

            # One MLP pass for both pooled vectors (2 matmuls instead of 4).
            pooled = jnp.concatenate([avg, mx], axis=0)            # (2, C)
            w1 = w1_ref[...].astype(jnp.float32)                   # (hidden, C)
            w2 = w2_ref[...].astype(jnp.float32)                   # (C, hidden)

            h = jax.lax.dot_general(
                pooled, w1,
                dimension_numbers=(((1,), (1,)), ((), ())),
                preferred_element_type=jnp.float32)                # (2, hidden)
            h = jnp.maximum(h, 0.0)
            y = jax.lax.dot_general(
                h, w2,
                dimension_numbers=(((1,), (1,)), ((), ())),
                preferred_element_type=jnp.float32)                # (2, C)

            out = jax.nn.sigmoid(y[0:1] + y[1:2])                  # (1, C)
            o_ref[...] = out.reshape(1, 1, C).astype(o_ref.dtype)

    return kernel


def channel_attention(x_nchw, w1, w2, *, tile_hw=None):
    """sigmoid(fc(avgpool(x)) + fc(maxpool(x))) with fc = Linear -> ReLU -> Linear.

    x_nchw: (B, C, H, W), any float dtype (bf16 recommended: kernel is HBM-bound).
    w1: (C//r, C), w2: (C, C//r) — PyTorch nn.Linear (out, in) layout, no bias.
    Returns (B, C, 1, 1) in x's dtype.
    """
    B, C, H, W = x_nchw.shape
    HW = H * W
    hidden = w1.shape[0]
    assert w1.shape == (hidden, C) and w2.shape == (C, hidden)

    itemsize = jnp.dtype(x_nchw.dtype).itemsize
    budget, vmem_limit = _vmem_budgets()

    hw_pad = _round_up(HW, _LANE)
    if tile_hw is None:
        tile_hw = _pick_tile_hw(hw_pad, C * itemsize, budget)
    assert tile_hw % _LANE == 0 and hw_pad % tile_hw == 0, (
        "tile_hw must be a multiple of 128 that divides round_up(H*W, 128)")

    x3 = x_nchw.reshape(B, C, HW)
    has_pad = hw_pad != HW
    if has_pad:
        # Zero padding: exact for the sum/mean path; max path masks it in-kernel.
        x3 = jnp.pad(x3, ((0, 0), (0, 0), (0, hw_pad - HW)))

    num_steps = hw_pad // tile_hw
    chunk_w = _LANE
    num_chunks = tile_hw // chunk_w

    kernel = _make_channel_attention_kernel(
        C, num_chunks, chunk_w, tile_hw, HW, 1.0 / HW, has_pad)

    out = pl.pallas_call(
        kernel,
        out_shape=jax.ShapeDtypeStruct((B, 1, C), x3.dtype),
        grid_spec=pltpu.PrefetchScalarGridSpec(
            num_scalar_prefetch=0,
            # Batch axis parallel (v7x megacore), HW axis is the reduction.
            grid=(B, num_steps),
            in_specs=[
                # x streamed over the spatial axis (double-buffered by Pallas).
                pl.BlockSpec((1, C, tile_hw), lambda b, k: (b, 0, k)),
                # Weights: same block every step -> stay resident in VMEM.
                pl.BlockSpec((hidden, C), lambda b, k: (0, 0)),
                pl.BlockSpec((C, hidden), lambda b, k: (0, 0)),
            ],
            out_specs=pl.BlockSpec((1, 1, C), lambda b, k: (b, 0, 0)),
            scratch_shapes=[
                pltpu.VMEM((1, C, chunk_w), jnp.float32),   # running sum
                pltpu.VMEM((1, C, chunk_w), jnp.float32),   # running max
            ],
        ),
        compiler_params=pltpu.CompilerParams(
            dimension_semantics=("parallel", "arbitrary"),
            vmem_limit_bytes=vmem_limit,
        ),
    )(x3, w1, w2)

    return out.reshape(B, C, 1, 1)


if __name__ == "__main__":
    key = jax.random.PRNGKey(0)
    kx, kw1, kw2, kx2 = jax.random.split(key, 4)

    B, C, H, W = 2, 64, 16, 16
    reduction = 16
    hidden = C // reduction

    x = jax.random.normal(kx, (B, C, H, W), dtype=jnp.float32)
    # PyTorch nn.Linear weight shape is (out_features, in_features), no bias.
    w1 = jax.random.normal(kw1, (hidden, C), dtype=jnp.float32) * (1.0 / C) ** 0.5
    w2 = jax.random.normal(kw2, (C, hidden), dtype=jnp.float32) * (1.0 / hidden) ** 0.5

    def ref_channel_attention(xf, w1f, w2f):
        avg = jnp.mean(xf, axis=(2, 3))
        mx = jnp.max(xf, axis=(2, 3))
        fc = lambda v: jnp.maximum(v @ w1f.T, 0.0) @ w2f.T
        out = jax.nn.sigmoid(fc(avg) + fc(mx))
        return out.reshape(xf.shape[0], xf.shape[1], 1, 1)

    ref = ref_channel_attention(x, w1, w2)

    # 1) Forced 128-lane tiles -> grid (B, 2): exercises the streamed chunk
    #    loop, pl.when init/finalize, and the pipelined multi-step path.
    out = jax.block_until_ready(channel_attention(x, w1, w2, tile_hw=128))
    assert out.shape == (B, C, 1, 1)
    assert jnp.allclose(out, ref, atol=1e-5, rtol=1e-5)

    # 2) Auto-tiled path (single block per batch here because H*W is small).
    out_auto = jax.block_until_ready(channel_attention(x, w1, w2))
    assert jnp.allclose(out_auto, ref, atol=1e-5, rtol=1e-5)

    # 3) Ragged spatial extent (14*14 = 196, not a multiple of 128):
    #    exercises the zero-pad + in-kernel -inf max mask path.
    x_rag = jax.random.normal(kx2, (B, C, 14, 14), dtype=jnp.float32)
    out_rag = jax.block_until_ready(channel_attention(x_rag, w1, w2, tile_hw=128))
    ref_rag = ref_channel_attention(x_rag, w1, w2)
    assert jnp.allclose(out_rag, ref_rag, atol=1e-5, rtol=1e-5)

    # 4) bf16 streamed input (halves HBM bytes; accumulation stays f32).
    x_bf = x.astype(jnp.bfloat16)
    out_bf = jax.block_until_ready(channel_attention(x_bf, w1, w2, tile_hw=128))
    ref_bf = ref_channel_attention(x_bf.astype(jnp.float32), w1, w2)
    assert jnp.allclose(out_bf.astype(jnp.float32), ref_bf, atol=1e-2, rtol=1e-2)

    print("KERNEL_OK")
</pallas_src>

<mosaic_0001>
module attributes {stable_mosaic.version = 11 : i64} {
  func.func @kernel(%arg0: i32, %arg1: i32, %arg2: memref<1x64x128xf32, #tpu.memory_space<vmem>>, %arg3: memref<4x64xf32, #tpu.memory_space<vmem>>, %arg4: memref<64x4xf32, #tpu.memory_space<vmem>>, %arg5: memref<1x1x64xf32, #tpu.memory_space<vmem>>, %arg6: memref<1x64x128xf32, #tpu.memory_space<vmem>>, %arg7: memref<1x64x128xf32, #tpu.memory_space<vmem>>) attributes {dimension_semantics = [#tpu.dimension_semantics<parallel>, #tpu.dimension_semantics<arbitrary>], iteration_bounds = array<i64: 2, 2>, scalar_prefetch = 0 : i64, scratch_operands = 2 : i64, tpu.core_type = #tpu.core_type<tc>, window_params = [{transform_indices = @transform_0, window_bounds = array<i64: 1, 64, 128>}, {pipeline_mode = #tpu.pipeline_mode<synchronous>, transform_indices = @transform_1, window_bounds = array<i64: 4, 64>}, {pipeline_mode = #tpu.pipeline_mode<synchronous>, transform_indices = @transform_2, window_bounds = array<i64: 64, 4>}, {transform_indices = @transform_3, window_bounds = array<i64: 1, 1, 64>}]} {
    %c0_i32 = arith.constant 0 : i32
    %0 = arith.cmpi eq, %arg1, %c0_i32 : i32
    %1 = arith.extui %0 : i1 to i32
    %c0_i32_0 = arith.constant 0 : i32
    %2 = arith.cmpi ne, %1, %c0_i32_0 : i32
    scf.if %2 {
      %cst = arith.constant 0.000000e+00 : f32
      %16 = vector.broadcast %cst : f32 to vector<1x64x128xf32>
      %c0_17 = arith.constant 0 : index
      %c0_18 = arith.constant 0 : index
      %c0_19 = arith.constant 0 : index
      %17 = vector.load %arg6[%c0_17, %c0_18, %c0_19] : memref<1x64x128xf32, #tpu.memory_space<vmem>>, vector<1x64x128xf32>
      tpu.vector_store %arg6[%c0_17, %c0_18, %c0_19], %16 {strides = array<i32>} : memref<1x64x128xf32, #tpu.memory_space<vmem>>, vector<1x64x128xf32>,
      %cst_20 = arith.constant 0xFF800000 : f32
      %18 = vector.broadcast %cst_20 : f32 to vector<1x64x128xf32>
      %c0_21 = arith.constant 0 : index
      %c0_22 = arith.constant 0 : index
      %c0_23 = arith.constant 0 : index
      %19 = vector.load %arg7[%c0_21, %c0_22, %c0_23] : memref<1x64x128xf32, #tpu.memory_space<vmem>>, vector<1x64x128xf32>
      tpu.vector_store %arg7[%c0_21, %c0_22, %c0_23], %18 {strides = array<i32>} : memref<1x64x128xf32, #tpu.memory_space<vmem>>, vector<1x64x128xf32>,
    } else {
    }
    %c0_i32_1 = arith.constant 0 : i32
    %c128_i32 = arith.constant 128 : i32
    %3 = arith.muli %c0_i32_1, %c128_i32 : i32
    %4 = tpu.assume_multiple %3, 128 : i32
    %c0 = arith.constant 0 : index
    %c0_2 = arith.constant 0 : index
    %5 = arith.index_cast %4 : i32 to index
    %6 = vector.load %arg2[%c0, %c0_2, %5] : memref<1x64x128xf32, #tpu.memory_space<vmem>>, vector<1x64x128xf32>
    %c0_3 = arith.constant 0 : index
    %c0_4 = arith.constant 0 : index
    %c0_5 = arith.constant 0 : index
    %7 = vector.load %arg6[%c0_3, %c0_4, %c0_5] : memref<1x64x128xf32, #tpu.memory_space<vmem>>, vector<1x64x128xf32>
    %8 = arith.addf %7, %6 : vector<1x64x128xf32>
    %c0_6 = arith.constant 0 : index
    %c0_7 = arith.constant 0 : index
    %c0_8 = arith.constant 0 : index
    %9 = vector.load %arg6[%c0_6, %c0_7, %c0_8] : memref<1x64x128xf32, #tpu.memory_space<vmem>>, vector<1x64x128xf32>
    tpu.vector_store %arg6[%c0_6, %c0_7, %c0_8], %8 {strides = array<i32>} : memref<1x64x128xf32, #tpu.memory_space<vmem>>, vector<1x64x128xf32>,
    %c0_9 = arith.constant 0 : index
    %c0_10 = arith.constant 0 : index
    %c0_11 = arith.constant 0 : index
    %10 = vector.load %arg7[%c0_9, %c0_10, %c0_11] : memref<1x64x128xf32, #tpu.memory_space<vmem>>, vector<1x64x128xf32>
    %11 = arith.maximumf %10, %6 : vector<1x64x128xf32>
    %c0_12 = arith.constant 0 : index
    %c0_13 = arith.constant 0 : index
    %c0_14 = arith.constant 0 : index
    %12 = vector.load %arg7[%c0_12, %c0_13, %c0_14] : memref<1x64x128xf32, #tpu.memory_space<vmem>>, vector<1x64x128xf32>
    tpu.vector_store %arg7[%c0_12, %c0_13, %c0_14], %11 {strides = array<i32>} : memref<1x64x128xf32, #tpu.memory_space<vmem>>, vector<1x64x128xf32>,
    %c1_i32 = arith.constant 1 : i32
    %c1_i32_15 = arith.constant 1 : i32
    %13 = arith.cmpi eq, %arg1, %c1_i32_15 : i32
    %14 = arith.extui %13 : i1 to i32
    %c0_i32_16 = arith.constant 0 : i32
    %15 = arith.cmpi ne, %14, %c0_i32_16 : i32
    scf.if %15 {
      %c0_17 = arith.constant 0 : index
      %c0_18 = arith.constant 0 : index
      %c0_19 = arith.constant 0 : index
      %16 = vector.load %arg6[%c0_17, %c0_18, %c0_19] : memref<1x64x128xf32, #tpu.memory_space<vmem>>, vector<1x64x128xf32>
      %cst = arith.constant dense<0.000000e+00> : vector<1x64xf32>
      %17 = vector.multi_reduction <add>, %16, %cst [2] : vector<1x64x128xf32> to vector<1x64xf32>
      %cst_20 = arith.constant 3.906250e-03 : f32
      %18 = vector.broadcast %cst_20 : f32 to vector<1x64xf32>
      %19 = arith.mulf %17, %18 : vector<1x64xf32>
      %c0_21 = arith.constant 0 : index
      %c0_22 = arith.constant 0 : index
      %c0_23 = arith.constant 0 : index
      %20 = vector.load %arg7[%c0_21, %c0_22, %c0_23] : memref<1x64x128xf32, #tpu.memory_space<vmem>>, vector<1x64x128xf32>
      %cst_24 = arith.constant dense<0xFF800000> : vector<1x64xf32>
      %21 = vector.multi_reduction <maximumf>, %20, %cst_24 [2] : vector<1x64x128xf32> to vector<1x64xf32>
      %22 = tpu.concatenate %19, %21 in 0 : vector<1x64xf32>, vector<1x64xf32> -> vector<2x64xf32>
      %c0_25 = arith.constant 0 : index
      %c0_26 = arith.constant 0 : index
      %23 = vector.load %arg3[%c0_25, %c0_26] : memref<4x64xf32, #tpu.memory_space<vmem>>, vector<4x64xf32>
      %c0_27 = arith.constant 0 : index
      %c0_28 = arith.constant 0 : index
      %24 = vector.load %arg4[%c0_27, %c0_28] : memref<64x4xf32, #tpu.memory_space<vmem>>, vector<64x4xf32>
      %cst_29 = arith.constant dense<0.000000e+00> : vector<2x4xf32>
      %25 = tpu.matmul %22, %23, %cst_29 {dimension_numbers = #tpu.dot_dimension_numbers<[1], [1], [0], [0], [0, 0, 1, 0], [], []>} : vector<2x64xf32>, vector<4x64xf32>, vector<2x4xf32> -> vector<2x4xf32>
      %cst_30 = arith.constant 0.000000e+00 : f32
      %26 = vector.broadcast %cst_30 : f32 to vector<2x4xf32>
      %27 = arith.maximumf %25, %26 : vector<2x4xf32>
      %cst_31 = arith.constant dense<0.000000e+00> : vector<2x64xf32>
      %28 = tpu.matmul %27, %24, %cst_31 {dimension_numbers = #tpu.dot_dimension_numbers<[1], [1], [0], [0], [0, 0, 1, 0], [], []>} : vector<2x4xf32>, vector<64x4xf32>, vector<2x64xf32> -> vector<2x64xf32>
      %29 = vector.extract_strided_slice %28 {offsets = [0, 0], sizes = [1, 64], strides = [1, 1]} : vector<2x64xf32> to vector<1x64xf32>
      %30 = vector.extract_strided_slice %28 {offsets = [1, 0], sizes = [1, 64], strides = [1, 1]} : vector<2x64xf32> to vector<1x64xf32>
      %31 = arith.addf %29, %30 : vector<1x64xf32>
      %32 = arith.negf %31 : vector<1x64xf32>
      %33 = math.exp %32 : vector<1x64xf32>
      %cst_32 = arith.constant 1.000000e+00 : f32
      %34 = vector.broadcast %cst_32 : f32 to vector<1x64xf32>
      %35 = arith.addf %34, %33 : vector<1x64xf32>
      %36 = arith.divf %34, %35 : vector<1x64xf32>
      %37 = vector.shape_cast %36 : vector<1x64xf32> to vector<1x1x64xf32>
      %c0_33 = arith.constant 0 : index
      %c0_34 = arith.constant 0 : index
      %c0_35 = arith.constant 0 : index
      %38 = vector.load %arg5[%c0_33, %c0_34, %c0_35] : memref<1x1x64xf32, #tpu.memory_space<vmem>>, vector<1x1x64xf32>
      tpu.vector_store %arg5[%c0_33, %c0_34, %c0_35], %37 {strides = array<i32>} : memref<1x1x64xf32, #tpu.memory_space<vmem>>, vector<1x1x64xf32>,
    } else {
    }
    return
  }
  func.func @transform_0(%arg0: i32, %arg1: i32) -> (i32, i32, i32) {
    %c0_i32 = arith.constant 0 : i32
    %c0_i32_0 = arith.constant 0 : i32
    return %arg0, %c0_i32, %arg1 : i32, i32, i32
  }
  func.func @transform_1(%arg0: i32, %arg1: i32) -> (i32, i32) {
    %c0_i32 = arith.constant 0 : i32
    %c0_i32_0 = arith.constant 0 : i32
    %c0_i32_1 = arith.constant 0 : i32
    return %c0_i32, %c0_i32_0 : i32, i32
  }
  func.func @transform_2(%arg0: i32, %arg1: i32) -> (i32, i32) {
    %c0_i32 = arith.constant 0 : i32
    %c0_i32_0 = arith.constant 0 : i32
    %c0_i32_1 = arith.constant 0 : i32
    return %c0_i32, %c0_i32_0 : i32, i32
  }
  func.func @transform_3(%arg0: i32, %arg1: i32) -> (i32, i32, i32) {
    %c0_i32 = arith.constant 0 : i32
    %c0_i32_0 = arith.constant 0 : i32
    %c0_i32_1 = arith.constant 0 : i32
    return %arg0, %c0_i32, %c0_i32_0 : i32, i32, i32
  }
}

</mosaic_0001>

<bundles_post_ra>
// kernel: tpu_custom_call.1
= control target key start
LH: loop header
LB: loop body
LE: loop exit
PB: predicated region body
PF: predicated region fallthrough
CT: control target
= control target key end

     0   :  { %8 = vsyncpa [#allocation5], 0  ;;  %s1400_s0 = inlined_call_operand.hbm [shape: f32[2,64,256], index: 0, kind: input, shape index: {}]   ;;  %s1401_s1 = inlined_call_operand.vmem [shape: f32[4,64], index: 1, kind: input, shape index: {}]   ;;  %s1402_s2 = inlined_call_operand.vmem [shape: f32[64,4], index: 2, kind: input, shape index: {}]   ;;  %s1403_s3 = inlined_call_operand.hbm [shape: f32[2,1,64], index: 3, kind: output, shape index: {}]  }
   0x1   :  { %10 = vsyncpa [#allocation5 + $0x1], 0 }
   0x2   :  { %11 = vsyncpa [#allocation6], 0 }
   0x3   :  { %13 = vsyncpa [#allocation6 + $0x1], 0  ;;  %s1117_s12 = smov 0   ;;  %s1119_s13 = smov 0  }
   0x4   :  { %s1121_s14 = smov 0   ;;  %s1123_s15 = smov 0  }
   0x5   :  { %s1125_s16 = smov 0   ;;  %s1127_s17 = smov 0  }
   0x6   :  { %s1129_s18 = smov 0   ;;  %s1131_s19 = smov 0  }
   0x7   :  { %s1133_s20 = smov 0   ;;  %s1135_s21 = smov 0  }
   0x8   :  { %s1137_s22 = smov 0  }
   0x9 LB: > { %s742_s23 = sadd.s32 4294967295, %s1085_s22   ;;  %s743_s24 = sadd.s32 4294967294, %s1085_s22   ;;  %s1085_s22 = sphi %s1137_s22, %s19_s22   ;;  %s1081_s21 = sphi %s1135_s21, %s1429_s21   ;;  %s1077_s20 = sphi %s1133_s20, %s1428_s20   ;;  %s1073_s19 = sphi %s1131_s19, %s1427_s19   ;;  %s1069_s18 = sphi %s1129_s18, %s1426_s18   ;;  %s1065_s17 = sphi %s1127_s17, %s1425_s17   ;;  %s1061_s16 = sphi %s1125_s16, %s1424_s16   ;;  %s1057_s15 = sphi %s1123_s15, %s1423_s15   ;;  %s1053_s14 = sphi %s1121_s14, %s1422_s14   ;;  %s1049_s13 = sphi %s1119_s13, %s1421_s13   ;;  %s1045_s12 = sphi %s1117_s12, %s1420_s12  }
   0xa   : > { %s28_s25 = sadd.s32 1, %s1077_s20  ;;  %s31_s26 = sadd.s32 1, %s1081_s21 }
   0xb   : > { %p29_p0 = scmp.ge.s32.totalorder %s28_s25, 2  ;;  %s40_s27 = sadd.s32 1, %s1065_s17 }
   0xc   : > { %p47_p1 = scmp.ne.s32.totalorder %s1065_s17, %s1061_s16  ;;  %p48_p2 = scmp.eq.s32.totalorder %s1085_s22, 0 }
   0xd   : > { %s1431_s25 = smov (%p29_p0, %s28_s25), 0  ;;  %s1433_s26 = smov (!%p29_p0, %s31_s26), %s1081_s21 }
   0xe   : > { %1407 = sst [smem:[#allocation10_spill]] %s1431_s25  ;;  %s36_s28 = ssub.s32 %s1077_s20, %s1431_s25 }
   0xf   : > { %p1183_p3 = por %p48_p2, %p47_p1  ;;  %p33_p4 = scmp.ge.s32.totalorder %s1433_s26, 2 }
  0x10   : > { %p53_p5 = scmp.ne.s32.totalorder %s1061_s16, %s1057_s15  ;;  %p54_p6 = scmp.eq.s32.totalorder %s742_s23, 0 }
  0x11   : > { %s108_s30 = sadd.s32 1, %s1053_s14  ;;  %s1435_s26 = smov (%p33_p4, %s1433_s26), 0 }
  0x12   : > { %1409 = sst [smem:[#allocation11_spill]] %s1435_s26  ;;  %p1191_p7 = por %p54_p6, %p53_p5 }
  0x13   : > { %p118_p8 = scmp.ne.s32.totalorder %s1053_s14, %s1049_s13  ;;  %s35_s5 = ssub.s32 %s1081_s21, %s1435_s26 }
  0x14   : > { %p119_p9 = scmp.eq.s32.totalorder %s742_s23, 3  ;;  %s37_s6 = sor.u32 %s36_s28, %s35_s5 }
  0x15   : > { %p106_p10 = scmp.eq.s32.totalorder %s35_s5, 0  ;;  %p38_p11 = scmp.eq.s32.totalorder %s37_s6, 0 }
  0x16   : > { %p1199_p12 = por %p119_p9, %p118_p8  ;;  %p124_p13 = scmp.ne.s32.totalorder %s1049_s13, %s1045_s12 }
  0x17   : > { %s1204_s8 = scalar_select %p106_p10, %s1053_s14, %s108_s30  }
  0x18   : > { %s1411_s7 = scalar_select %p1199_p12, 1, 0 }
  0x19   : > { %s1207_s9 = scalar_select %p38_p11, %s1065_s17, %s40_s27  }
  0x1a   : > { %p125_p0 = scmp.eq.s32.totalorder %s743_s24, 3  ;;  %p831_p1 = scmp.lt.s32.totalorder %s1085_s22, 4 }
  0x1b   : > { %s151_s11 = sand.u32 1, %s1065_s17   ;;  %s747_s23 = sshll.u32 %s1081_s21, 4 }
  0x1c   : > { %p1212_p2 = por %p125_p0, %p124_p13  ;;  %s746_s15 = sshll.u32 %s151_s11, 6 }
  0x1d   : > { %s160_s28 = sadd.s32 %s1077_s20, %s747_s23  ;;  %s155_s5 = scalar_lea.vmem [#allocation4], %s746_s15 }
  0x1e   : > { %s1412_s10 = scalar_select %p1212_p2, 1, 0 }
  0x1f   : > { %s163_s6 = sshll.u32 %s155_s5, 4  ;;  %s748_s26 = sshll.u32 %s160_s28, 7  ;;  %s1219_s6 = int_to_ptr.vmem [resolvable:$true] %s163_s6 }
  0x20   : > { %s1224_s27 = scalar_lea.hbm %s1400_s0, %s748_s26  ;;  %p1228_p4 = pnand %p831_p1, %p1183_p3 }
  0x21   : > { %s1232_s15 = scalar_lea.sflag [#allocation5], %s151_s11  ;;  %s933_s23 = scalar_lea.hbm %s1224_s27, 1024 }
  0x22   : > { %p934_p5 = scmp.ne.s32.totalorder %s1224_s27, %s933_s23  ;;  %p935_p6 = pneg %p1228_p4 }
  0x23   : > { %s938_s29 = scalar_lea.hbm %s1400_s0, 4096  ;;  %p939_p3 = scmp.lt.u32.totalorder %s1224_s27, %s1400_s0 }
  0x24   : > { %p936_p8 = pnand %p935_p6, %p934_p5  ;;  %p940_p10 = scmp.lt.u32.totalorder %s938_s29, %s933_s23 }
  0x25   : > { %p942_p13 = scmp.lt.u32.totalorder %s933_s23, %s1224_s27 }
  0x26   : > { %p937_p9 = pneg %p936_p8  ;;  %p941_p11 = por %p940_p10, %p939_p3 }
  0x28   : > { %p943_p0 = por %p942_p13, %p941_p11 }
  0x2a   : > { %p944_p1 = pnand %p943_p0, %p937_p9 }
  0x2c   : > { %947 = shalt.err (!%p944_p1)
}
  0x2d   : > { %s948_s11 = scalar_lea.vmem %s1219_s6, 1024  ;;  %s1087_s30 = smov [#allocation4]  }
  0x2e   : > { %p949_p5 = scmp.ne.s32.totalorder %s1219_s6, %s948_s11  ;;  %s953_s25 = sshll.u32 %s1087_s30, 4  ;;  %s954_s25 = int_to_ptr.vmem [resolvable:$false] %s953_s25 }
  0x2f   : > { %s955_s26 = scalar_lea.vmem %s954_s25, 2048  ;;  %p956_p12 = scmp.lt.s32.totalorder %s1219_s6, %s954_s25 }
  0x30   : > { %p951_p8 = pnand %p949_p5, %p935_p6  ;;  %p957_p3 = scmp.lt.s32.totalorder %s955_s26, %s948_s11 }
  0x32   : > { %p952_p2 = pneg %p951_p8  ;;  %p958_p10 = por %p957_p3, %p956_p12 }
  0x34   : > { %p959_p11 = pnand %p958_p10, %p952_p2 }
  0x36   : > { %962 = shalt.err (!%p959_p11)
}
  0x37   : > { %s1088_s23 = smov 256   ;;  %s1089_s29 = smov 128  }
  0x38   : > { %s1090_s28 = smov 8   ;;  %p749_p6 = scmp.ge.s32.totalorder %s1085_s22, 1 }
  0x39   : > { %826 = dma.hbm_to_vmem [thread:$0]  (!%p1228_p4), %s1224_s27, 1024, %s1219_s6, %s1232_s15, %s1088_s23, %s1089_s29, %s1090_s28  }
  0x3a   : > { %p171_p9 = scmp.lt.s32.totalorder %s1085_s22, 5 }
  0x3c   : > { %p172_p13 = pnand %p749_p6, %p171_p9 }
  0x3d   : > { %s177_s5 = sand.u32 (!%p172_p13), 1, %s1061_s16  }
  0x3e   : > { %175 = sbr.rel (%p172_p13) target bundleno = 749 (0x2ed), region = 32  ;;  %s750_s11 = sshll.u32 (!%p172_p13), %s177_s5, 6 }
  0x3f   : > { %s178_s30 = scalar_lea.sflag (!%p172_p13), [#allocation5], %s177_s5  ;;  %s1263_s25 = scalar_lea.vmem (!%p172_p13), [#allocation4], %s750_s11 }
  0x45   : > { %1036 = dma.done.wait (%p1191_p7), %s178_s30, 1024  }
  0x46   : > { %1038 = vsyncadd (%p1191_p7), %s178_s30, 4294966272  ;;  %s201_s24 = sand.u32 1, %s1049_s13   ;;  %p751_p12 = scmp.ne.s32.totalorder %s1069_s18, 0 }
  0x47   : > { %s1272_s6 = scalar_lea.vmem [#allocation7], %s201_s24  ;;  %v1091_v0 = vmov (!%p751_p12), 0.0   ;;  %v1092_v1 = vmov (!%p751_p12), -inf  }
  0x48   : > { %206 = sbr.rel (%p751_p12) target bundleno = 80 (0x50), region = 40  ;;  %207 = vst [vmem:[#allocation2] sm:$0xff] (!%p751_p12), %v1091_v0  ;;  %208 = vst [vmem:[#allocation2 + $0x8] sm:$0xff] (!%p751_p12), %v1091_v0 }
  0x49   : > { %209 = vst [vmem:[#allocation2 + $0x10] sm:$0xff] (!%p751_p12), %v1091_v0  ;;  %210 = vst [vmem:[#allocation2 + $0x18] sm:$0xff] (!%p751_p12), %v1091_v0 }
  0x4a   : > { %211 = vst [vmem:[#allocation2 + $0x20] sm:$0xff] (!%p751_p12), %v1091_v0  ;;  %212 = vst [vmem:[#allocation2 + $0x28] sm:$0xff] (!%p751_p12), %v1091_v0 }
  0x4b   : > { %213 = vst [vmem:[#allocation2 + $0x30] sm:$0xff] (!%p751_p12), %v1091_v0  ;;  %214 = vst [vmem:[#allocation2 + $0x38] sm:$0xff] (!%p751_p12), %v1091_v0 }
  0x4c   : > { %215 = vst [vmem:[#allocation3] sm:$0xff] (!%p751_p12), %v1092_v1  ;;  %216 = vst [vmem:[#allocation3 + $0x8] sm:$0xff] (!%p751_p12), %v1092_v1 }
  0x4d   : > { %217 = vst [vmem:[#allocation3 + $0x10] sm:$0xff] (!%p751_p12), %v1092_v1  ;;  %218 = vst [vmem:[#allocation3 + $0x18] sm:$0xff] (!%p751_p12), %v1092_v1 }
  0x4e   : > { %219 = vst [vmem:[#allocation3 + $0x20] sm:$0xff] (!%p751_p12), %v1092_v1  ;;  %220 = vst [vmem:[#allocation3 + $0x28] sm:$0xff] (!%p751_p12), %v1092_v1 }
  0x4f   : > { %221 = vst [vmem:[#allocation3 + $0x30] sm:$0xff] %v1092_v1  ;;  %222 = vst [vmem:[#allocation3 + $0x38] sm:$0xff] %v1092_v1 }
  0x50 PF: > { %v223_v2 = vld [vmem:[%s1263_s25] sm:$0xff]  ;;  %v224_v4 = vld [vmem:[%s1263_s25 + $0x8] sm:$0xff]  ;;  %v225_v7 = vld [vmem:[%s1263_s25 + $0x10] sm:$0xff]  ;;  %p752_p7 = scmp.ne.s32.totalorder %s1069_s18, 1 }
  0x51   : > { %v231_v3 = vld [vmem:[#allocation2] sm:$0xff]  ;;  %v232_v6 = vld [vmem:[#allocation2 + $0x8] sm:$0xff]  ;;  %v233_v8 = vld [vmem:[#allocation2 + $0x10] sm:$0xff]  ;;  %v1093_v58 = vmov (!%p752_p7), 0.0   ;;  %vm462_vm0 = vcmask (!%p752_p7), 523264   ;;  %vm1094_vm1 = vmmov (!%p752_p7), 0  }
  0x52   : > { %v239_v5 = vadd.f32 %v231_v3, %v223_v2  ;;  %v240_v9 = vadd.f32 %v232_v6, %v224_v4  ;;  %v241_v10 = vadd.f32 %v233_v8, %v225_v7  ;;  %v226_v11 = vld [vmem:[%s1263_s25 + $0x18] sm:$0xff]  ;;  %v227_v13 = vld [vmem:[%s1263_s25 + $0x20] sm:$0xff]  ;;  %v228_v16 = vld [vmem:[%s1263_s25 + $0x28] sm:$0xff]  ;;  %779 = vmatprep.subr.mxu0 (!%p752_p7), %v1093_v58  ;;  %781 = vmatprep.mubr.msk.f32.mxu0 (!%p752_p7), %vm1094_vm1, %v1093_v58  ;;  %vm540_vm2 = vcmask (!%p752_p7), 31744  }
  0x53   : > { %v234_v12 = vld [vmem:[#allocation2 + $0x18] sm:$0xff]  ;;  %v235_v15 = vld [vmem:[#allocation2 + $0x20] sm:$0xff]  ;;  %v236_v17 = vld [vmem:[#allocation2 + $0x28] sm:$0xff]  ;;  %800 = vmatprep.mubr.msk.f32.mxu1 (!%p752_p7), %vm1094_vm1, %v1093_v58  ;;  %v1095_v62 = vmov (!%p752_p7), 0.0|0.0   ;;  %vm358_vm4 = vcmask (!%p752_p7), 130112   ;;  %vm365_vm5 = vcmask (!%p752_p7), 195712  }
  0x54   : > { %247 = vst [vmem:[#allocation2] sm:$0xff] %v239_v5  ;;  %v242_v14 = vadd.f32 %v234_v12, %v226_v11  ;;  %248 = vst [vmem:[#allocation2 + $0x8] sm:$0xff] %v240_v9  ;;  %v243_v18 = vadd.f32 %v235_v15, %v227_v13  ;;  %v244_v19 = vadd.f32 %v236_v17, %v228_v16  ;;  %v229_v20 = vld [vmem:[%s1263_s25 + $0x30] sm:$0xff]  ;;  %v230_v22 = vld [vmem:[%s1263_s25 + $0x38] sm:$0xff]  ;;  %803 = vmatprep.subr.bf16.mxu1 (!%p752_p7), %v1095_v62  ;;  %v347_v12 = vlaneseq (!%p752_p7) }
  0x55   : > { %249 = vst [vmem:[#allocation2 + $0x10] sm:$0xff] %v241_v10  ;;  %v237_v21 = vld [vmem:[#allocation2 + $0x30] sm:$0xff]  ;;  %v238_v24 = vld [vmem:[#allocation2 + $0x38] sm:$0xff]  ;;  %v255_v25 = vld [vmem:[#allocation3] sm:$0xff]  ;;  %vm372_vm6 = vcmask (!%p752_p7), 261312   ;;  %vm379_vm7 = vcmask (!%p752_p7), 326912  }
  0x56   : > { %250 = vst [vmem:[#allocation2 + $0x18] sm:$0xff] %v242_v14  ;;  %v245_v23 = vadd.f32 %v237_v21, %v229_v20  ;;  %v256_v26 = vld [vmem:[#allocation3 + $0x8] sm:$0xff]  ;;  %251 = vst [vmem:[#allocation2 + $0x20] sm:$0xff] %v243_v18  ;;  %v246_v27 = vadd.f32 %v238_v24, %v230_v22  ;;  %v263_v28 = vmax.f32 %v255_v25, %v223_v2  ;;  %v257_v30 = vld [vmem:[#allocation3 + $0x10] sm:$0xff]  ;;  %282 = sbr.rel (%p752_p7) target bundleno = 724 (0x2d4), region = 44  ;;  %v348_v15 = vand.u32 (!%p752_p7), 127, %v347_v12 }
  0x57   : > { %252 = vst [vmem:[#allocation2 + $0x28] sm:$0xff] %v244_v19  ;;  %v264_v29 = vmax.f32 %v256_v26, %v224_v4  ;;  %v258_v31 = vld [vmem:[#allocation3 + $0x18] sm:$0xff]  ;;  %v259_v32 = vld [vmem:[#allocation3 + $0x20] sm:$0xff]  ;;  %v265_v33 = vmax.f32 %v257_v30, %v225_v7  ;;  %v260_v36 = vld [vmem:[#allocation3 + $0x28] sm:$0xff]  ;;  %v350_v19 = vshrl.u32 (!%p752_p7), %v347_v12, 7  ;;  %vm386_vm8 = vcmask (!%p752_p7), 392512  }
  0x58   : > { %253 = vst [vmem:[#allocation2 + $0x30] sm:$0xff] %v245_v23  ;;  %v266_v34 = vmax.f32 %v258_v31, %v226_v11  ;;  %v267_v35 = vmax.f32 %v259_v32, %v227_v13  ;;  %v261_v37 = vld [vmem:[#allocation3 + $0x30] sm:$0xff]  ;;  %v262_v38 = vld [vmem:[#allocation3 + $0x38] sm:$0xff]  ;;  %254 = vst [vmem:[#allocation2 + $0x38] sm:$0xff] %v246_v27  ;;  %v268_v39 = vmax.f32 %v260_v36, %v228_v16  ;;  %v353_v18 = vadd.s32 (!%p752_p7), 4294967288, %v348_v15 }
  0x59   : > { %271 = vst [vmem:[#allocation3] sm:$0xff] %v263_v28  ;;  %272 = vst [vmem:[#allocation3 + $0x8] sm:$0xff] %v264_v29  ;;  %v269_v40 = vmax.f32 %v261_v37, %v229_v20  ;;  %v270_v41 = vmax.f32 %v262_v38, %v230_v22  ;;  %v453_v59 = vld [vmem:[%s1401_s1] sm:$0xf] (!%p752_p7)  ;;  %v455_v61 = vld [vmem:[%s1402_s2 + $0x8] sm:$0xff] (!%p752_p7)  ;;  %v360_v24 = vadd.s32 (!%p752_p7), 4294967280, %v348_v15  ;;  %v351_v25 = vsub.s32 (!%p752_p7), %v348_v15, %v350_v19 }
  0x5a   : > { %273 = vst [vmem:[#allocation3 + $0x10] sm:$0xff] %v265_v33  ;;  %274 = vst [vmem:[#allocation3 + $0x18] sm:$0xff] %v266_v34  ;;  %780 = vmatpush3.xpose.msk.msra.mxu0 (!%p752_p7), %vm462_vm0, %v453_v59  ;;  %v454_v60 = vld [vmem:[%s1402_s2] sm:$0xff] (!%p752_p7)  ;;  %v456_v1 = vld [vmem:[%s1402_s2 + $0x10] sm:$0xff] (!%p752_p7)  ;;  %v356_v22 = vsub.s32 (!%p752_p7), %v353_v18, %v350_v19  ;;  %v367_v27 = vadd.s32 (!%p752_p7), 4294967272, %v348_v15  ;;  %v374_v30 = vadd.s32 (!%p752_p7), 4294967264, %v348_v15 }
  0x5b   : > { %275 = vst [vmem:[#allocation3 + $0x20] sm:$0xff] %v267_v35  ;;  %276 = vst [vmem:[#allocation3 + $0x28] sm:$0xff] %v268_v39  ;;  %v283_v43 = vld [vmem:[#allocation2] sm:$0xff] (!%p752_p7)  ;;  %v284_v45 = vld [vmem:[#allocation2 + $0x8] sm:$0xff] (!%p752_p7)  ;;  %v804_v63 = vpack.c.bf16 (!%p752_p7), %v455_v61, %v454_v60  ;;  %v381_v31 = vadd.s32 (!%p752_p7), 4294967256, %v348_v15  ;;  %v363_v33 = vsub.s32 (!%p752_p7), %v360_v24, %v350_v19  ;;  %v388_v35 = vadd.s32 (!%p752_p7), 4294967248, %v348_v15 }
  0x5c   : > { %277 = vst [vmem:[#allocation3 + $0x30] sm:$0xff] %v269_v40  ;;  %278 = vst [vmem:[#allocation3 + $0x38] sm:$0xff] %v270_v41  ;;  %v285_v42 = vld [vmem:[#allocation2 + $0x10] sm:$0xff] (!%p752_p7)  ;;  %291 = vadd.xlane.f32.xlu0 (!%p752_p7), %v283_v43  ;;  %v457_v2 = vld [vmem:[%s1402_s2 + $0x18] sm:$0xff] (!%p752_p7)  ;;  %v370_v37 = vsub.s32 (!%p752_p7), %v367_v27, %v350_v19  ;;  %v395_v41 = vadd.s32 (!%p752_p7), 4294967240, %v348_v15  ;;  %vm393_vm9 = vcmask (!%p752_p7), 458112  }
  0x5d   : > { %295 = vadd.xlane.f32.xlu1 %v285_v42  ;;  %v286_v44 = vld [vmem:[#allocation2 + $0x18] sm:$0xff]  ;;  %v287_v49 = vld [vmem:[#allocation2 + $0x20] sm:$0xff]  ;;  %vm1296_vm3 = vmpackc.low %vm540_vm2, %vm540_vm2  ;;  %v808_v3 = vpack.c.bf16 %v457_v2, %v456_v1  ;;  %v377_v42 = vsub.s32 %v374_v30, %v350_v19  ;;  %vm400_vm10 = vcmask 523712   ;;  %vm451_vm11 = vcmask 1040384  }
  0x5e   : > { %v288_v51 = vld [vmem:[#allocation2 + $0x28] sm:$0xff]  ;;  %806 = vmatpush3.bf16.xpose.msk.msra.mxu1 %vm1296_vm3, %v804_v63  ;;  %v458_v4 = vld [vmem:[%s1402_s2 + $0x20] sm:$0xff]  ;;  %v460_v7 = vld [vmem:[%s1402_s2 + $0x30] sm:$0xff]  ;;  %vm648_vm12 = vcmask 516096  }
  0x5f   : > { %v289_v53 = vld [vmem:[#allocation2 + $0x30] sm:$0xff]  ;;  %v290_v55 = vld [vmem:[#allocation2 + $0x38] sm:$0xff]  ;;  %807 = vmatprep.subr.bf16.mxu1 %v1095_v62  ;;  %v459_v5 = vld [vmem:[%s1402_s2 + $0x28] sm:$0xff] }
  0x60   : > { %293 = vadd.xlane.f32.xlu0 %v284_v45  ;;  %v316_v46 = vld [vmem:[#allocation3 + $0x8] sm:$0xff]  ;;  %v315_v47 = vld [vmem:[#allocation3] sm:$0xff]  ;;  %v812_v6 = vpack.c.bf16 %v459_v5, %v458_v4  ;;  %v461_v8 = vld [vmem:[%s1402_s2 + $0x38] sm:$0xff] }
  0x61   : > { %297 = vadd.xlane.f32.xlu1 %v286_v44  ;;  %v317_v48 = vld [vmem:[#allocation3 + $0x10] sm:$0xff]  ;;  %v318_v50 = vld [vmem:[#allocation3 + $0x18] sm:$0xff]  ;;  %v816_v9 = vpack.c.bf16 %v461_v8, %v460_v7  ;;  %v384_v44 = vsub.s32 %v381_v31, %v350_v19 }
  0x62   : > { %v319_v52 = vld [vmem:[#allocation3 + $0x20] sm:$0xff]  ;;  %v320_v54 = vld [vmem:[#allocation3 + $0x28] sm:$0xff] }
  0x63   : > { %v321_v56 = vld [vmem:[#allocation3 + $0x30] sm:$0xff]  ;;  %v322_v57 = vld [vmem:[#allocation3 + $0x38] sm:$0xff] }
  0x64   : > { %323 = vmax.xlane.f32.xlu0 %v315_v47 }
  0x65   : > { %325 = vmax.xlane.f32.xlu1 %v316_v46 }
  0x66   : > { %810 = vmatpush3.bf16.xpose.msk.msra.mxu1 %vm1296_vm3, %v808_v3 }
  0x67   : > { %811 = vmatprep.subr.bf16.mxu1 %v1095_v62 }
  0x68   : > { %299 = vadd.xlane.f32.xlu0 %v287_v49 }
  0x69   : > { %327 = vmax.xlane.f32.xlu1 %v317_v48 }
  0x6c   : > { %301 = vadd.xlane.f32.xlu0 %v288_v51  ;;  %v391_v51 = vsub.s32 %v388_v35, %v350_v19 }
  0x6d   : > { %329 = vmax.xlane.f32.xlu1 %v318_v50 }
  0x6e   : > { %814 = vmatpush3.bf16.xpose.msk.msra.mxu1 %vm1296_vm3, %v812_v6 }
  0x6f   : > { %815 = vmatprep.subr.bf16.mxu1 %v1095_v62 }
  0x70   : > { %303 = vadd.xlane.f32.xlu0 %v289_v53 }
  0x71   : > { %331 = vmax.xlane.f32.xlu1 %v319_v52 }
  0x74   : > { %305 = vadd.xlane.f32.xlu0 %v290_v55 }
  0x75   : > { %333 = vmax.xlane.f32.xlu1 %v320_v54 }
  0x76   : > { %818 = vmatpush3.bf16.xpose.msk.msra.mxu1 %vm1296_vm3, %v816_v9 }
  0x78   : > { %335 = vmax.xlane.f32.xlu0 %v321_v56  ;;  %v398_v56 = vsub.s32 %v395_v41, %v350_v19 }
  0x79   : > { %337 = vmax.xlane.f32.xlu1 %v322_v57 }
  0xe9   : > { %v292_v11 = vpop.xlane.xlu0 %291 }
  0xea   : > { %v296_v10 = vpop.xlane.xlu1 %295  ;;  %v307_v26 = vmul.f32 0.00390625, %v292_v11 }
  0xeb   : > { %v309_v34 = vmul.f32 0.00390625, %v296_v10 }
  0xec   : > { %v352_v36 = vrot.slane %v307_v26, %v351_v25 }
  0xed   : > { %v294_v14 = vpop.xlane.xlu0 %293  ;;  %v364_v49 = vrot.slane %v309_v34, %v363_v33 }
  0xee   : > { %v298_v13 = vpop.xlane.xlu1 %297  ;;  %v308_v23 = vmul.f32 0.00390625, %v294_v14 }
  0xef   : > { %v310_v38 = vmul.f32 0.00390625, %v298_v13 }
  0xf0   : > { %v357_v32 = vrot.slane %v308_v23, %v356_v22 }
  0xf1   : > { %v324_v17 = vpop.xlane.xlu0 %323  ;;  %v371_v53 = vrot.slane %v310_v38, %v370_v37 }
  0xf2   : > { %v326_v16 = vpop.xlane.xlu1 %325  ;;  %v359_v45 = vsel %vm358_vm4, %v357_v32, %v352_v36  ;;  %v414_v47 = vrot.slane %v324_v17, %v351_v25 }
  0xf3   : > { %v418_v46 = vrot.slane %v326_v16, %v356_v22  ;;  %v366_v58 = vsel %vm365_vm5, %v364_v49, %v359_v45 }
  0xf4   : > { %v373_v3 = vsel %vm372_vm6, %v371_v53, %v366_v58 }
  0xf5   : > { %v300_v21 = vpop.xlane.xlu0 %299  ;;  %v419_v62 = vsel %vm358_vm4, %v418_v46, %v414_v47 }
  0xf6   : > { %v328_v20 = vpop.xlane.xlu1 %327  ;;  %v311_v43 = vmul.f32 0.00390625, %v300_v21 }
  0xf7   : > { %v423_v50 = vrot.slane %v328_v20, %v363_v33 }
  0xf8   : > { %v378_v59 = vrot.slane %v311_v43, %v377_v42 }
  0xf9   : > { %v302_v29 = vpop.xlane.xlu0 %301  ;;  %v424_v1 = vsel %vm365_vm5, %v423_v50, %v419_v62 }
  0xfa   : > { %v330_v28 = vpop.xlane.xlu1 %329  ;;  %v312_v48 = vmul.f32 0.00390625, %v302_v29  ;;  %v380_v8 = vsel %vm379_vm7, %v378_v59, %v373_v3 }
  0xfb   : > { %v428_v54 = vrot.slane %v330_v28, %v370_v37 }
  0xfc   : > { %v385_v63 = vrot.slane %v312_v48, %v384_v44 }
  0xfd   : > { %v304_v40 = vpop.xlane.xlu0 %303  ;;  %v429_v4 = vsel %vm372_vm6, %v428_v54, %v424_v1 }
  0xfe   : > { %v332_v39 = vpop.xlane.xlu1 %331  ;;  %v313_v52 = vmul.f32 0.00390625, %v304_v40  ;;  %v387_v12 = vsel %vm386_vm8, %v385_v63, %v380_v8 }
  0xff   : > { %v433_v60 = vrot.slane %v332_v39, %v377_v42 }
 0x100   : > { %v392_v2 = vrot.slane %v313_v52, %v391_v51 }
 0x101   : > { %v306_v57 = vpop.xlane.xlu0 %305  ;;  %v434_v9 = vsel %vm379_vm7, %v433_v60, %v429_v4 }
 0x102   : > { %v334_v55 = vpop.xlane.xlu1 %333  ;;  %v314_v61 = vmul.f32 0.00390625, %v306_v57  ;;  %v394_v14 = vsel %vm393_vm9, %v392_v2, %v387_v12 }
 0x103   : > { %v438_v0 = vrot.slane %v334_v55, %v384_v44 }
 0x104   : > { %v399_v5 = vrot.slane %v314_v61, %v398_v56 }
 0x105   : > { %v336_v6 = vpop.xlane.xlu0 %335  ;;  %v439_v13 = vsel %vm386_vm8, %v438_v0, %v434_v9 }
 0x106   : > { %v338_v7 = vpop.xlane.xlu1 %337  ;;  %v443_v10 = vrot.slane %v336_v6, %v391_v51  ;;  %v401_v17 = vsel %vm400_vm10, %v399_v5, %v394_v14 }
 0x107   : > { %v448_v11 = vrot.slane %v338_v7, %v398_v56 }
 0x108   : > { %v444_v15 = vsel %vm393_vm9, %v443_v10, %v439_v13 }
 0x109   : > { %v449_v16 = vsel %vm400_vm10, %v448_v11, %v444_v15 }
 0x10a   : > { %v452_v18 = vsel %vm451_vm11, %v401_v17, %v449_v16 }
 0x10b   : > { %782 = vmatmul.mubr.msk.f32.vlgmr.msra.gmra.mrb[0].mxu0 %vm462_vm0, %v452_v18 }
 0x1de   : > { %v535_v19 = vpop.f32.mrb[0].mxu0 }
 0x1df   : > { %v539_v20 = vmax.f32 %v535_v19, 0.0  ;;  %v783_v21 = vpop.f32.mrb[1].mxu0 }
 0x1e1   : > { %801 = vmatmul.mubr.msk.f32.vlgmr.msra.gmra.mrb[0].mxu1 %vm540_vm2, %v539_v20 }
 0x2b4   : > { %v634_v22 = vpop.f32.mrb[0].mxu1 }
 0x2b5   : > { %v639_v23 = vrot.slane %v634_v22, 1  ;;  %v802_v24 = vpop.f32.mrb[1].mxu1 }
 0x2b7   : > { %v641_v25 = vadd.f32 %v639_v23, %v634_v22 }
 0x2b9   : > { %v764_v26 = vmul.f32 -1.442695, %v641_v25 }
 0x2bb   : > { %929 = vpow2.f32 %v764_v26 }
 0x2c5   : > { %v930_v27 = vpop.eup %929 }
 0x2c6   : > { %v645_v28 = vadd.f32 1.0, %v930_v27 }
 0x2c8   : > { %931 = vrcp.f32 %v645_v28 }
 0x2d2   : > { %v932_v29 = vpop.eup %931 }
 0x2d3   : > { %649 = vst.msk [vmem:[%s1272_s6] sm:$0x1] %vm648_vm12, %v932_v29 }
 0x2d4 PF: > { %s765_s29 = sshll.u32 %s1073_s19, 4  ;;  %s663_s30 = sshll.u32 %s1272_s6, 4  ;;  %s664_s30 = int_to_ptr.vmem [resolvable:$true] %s663_s30 }
 0x2d5   : > { %s1341_s11 = scalar_lea.hbm %s1403_s3, %s765_s29  ;;  %s651_s25 = scalar_lea.sflag [#allocation6], %s201_s24 }
 0x2d6   : > { %s963_s18 = scalar_lea.vmem %s664_s30, 16  ;;  %p1416_p4 = scmp.ne.s32.totalorder %s1411_s7, 0 }
 0x2d7   : > { %p964_p2 = scmp.ne.s32.totalorder %s664_s30, %s963_s18  ;;  %s1096_s4 = smov [#allocation7]  }
 0x2d8   : > { %s967_s27 = sshll.u32 %s1096_s4, 4  ;;  %s968_s27 = int_to_ptr.vmem [resolvable:$false] %s967_s27 }
 0x2d9   : > { %p965_p0 = pnand %p964_p2, %p1416_p4  ;;  %s969_s15 = scalar_lea.vmem %s968_s27, 32 }
 0x2da   : > { %p970_p5 = scmp.lt.s32.totalorder %s664_s30, %s968_s27  ;;  %p971_p8 = scmp.lt.s32.totalorder %s969_s15, %s963_s18 }
 0x2db   : > { %p966_p1 = pneg %p965_p0 }
 0x2dc   : > { %p972_p3 = por %p971_p8, %p970_p5 }
 0x2de   : > { %p973_p10 = pnand %p972_p3, %p966_p1 }
 0x2e0   : > { %976 = shalt.err (!%p973_p10)
}
 0x2e1   : > { %s977_s19 = scalar_lea.hbm %s1341_s11, 16  ;;  %s981_s26 = scalar_lea.hbm %s1403_s3, 32 }
 0x2e2   : > { %p978_p11 = scmp.ne.s32.totalorder %s1341_s11, %s977_s19  ;;  %p982_p13 = scmp.lt.u32.totalorder %s1341_s11, %s1403_s3 }
 0x2e3   : > { %p983_p12 = scmp.lt.u32.totalorder %s981_s26, %s977_s19  ;;  %p985_p2 = scmp.lt.u32.totalorder %s977_s19, %s1341_s11 }
 0x2e4   : > { %p979_p6 = pnand %p978_p11, %p1416_p4 }
 0x2e5   : > { %p984_p7 = por %p983_p12, %p982_p13 }
 0x2e6   : > { %p980_p9 = pneg %p979_p6 }
 0x2e7   : > { %p986_p0 = por %p985_p2, %p984_p7 }
 0x2e9   : > { %p987_p1 = pnand %p986_p0, %p980_p9 }
 0x2eb   : > { %990 = shalt.err (!%p987_p1)
}
 0x2ec   : > { %821 = dma.vmem_to_hbm [thread:$0]  (%p1416_p4), %s664_s30, 16, %s1341_s11, %s651_s25  }
 0x2ed PF: > { %p832_p5 = scmp.ge.s32.totalorder %s1085_s22, 2  ;;  %s675_s28 = sand.u32 1, %s1045_s12  }
 0x2ee   : > { %p1417_p8 = scmp.ne.s32.totalorder %s1412_s10, 0  ;;  %s676_s5 = scalar_lea.sflag [#allocation6], %s675_s28 }
 0x2f0   : > { %p828_p3 = pnand %p832_p5, %p1417_p8 }
 0x2f2   : > { %1040 = dma.done.wait (!%p828_p3), %s676_s5, 16  }
 0x2f3   : > { %1042 = vsyncadd (!%p828_p3), %s676_s5, 4294967280  ;;  %s19_s22 = sadd.s32 1, %s1085_s22   ;;  %s1418_s7 = sld [smem:[#allocation10_spill]] }
 0x2f4   : > { %p16_p10 = scmp.ge.s32.totalorder %s19_s22, 6   ;;  %s1419_s11 = sld [smem:[#allocation11_spill]] }
 0x2f5   : > { %s1420_s12 = smov %s1049_s13  ;;  %s1421_s13 = smov %s1053_s14 }
 0x2f6   : > { %s1422_s14 = smov %s1204_s8  ;;  %s1423_s15 = smov %s1061_s16 }
 0x2f7   : > { %s1424_s16 = smov %s1065_s17  ;;  %s1425_s17 = smov %s1207_s9 }
 0x2f8   : > { %s1426_s18 = smov %s1077_s20  ;;  %s1427_s19 = smov %s1081_s21 }
 0x2f9   : > { %s1428_s20 = smov %s1418_s7  ;;  %18 = sbr.rel (!%p16_p10) target bundleno = 9 (0x9), region = 85 }
 0x2fa   : > { %s1429_s21 = smov %s1419_s11 }
 0x300   :  { %680 = vsyncpa [#allocation5], 1 }
 0x301   :  { %682 = vsyncpa [#allocation5 + $0x1], 1 }
 0x302   :  { %683 = vsyncpa [#allocation6], 1 }
 0x303   :  { %685 = vsyncpa [#allocation6 + $0x1], 1 }

</bundles_post_ra>
